<compile_context>
chip_gen: v7x
topology: tpu7x:2x2x1
jax: 0.10.0
libtpu: 0.0.40
codegen_flags: <defaults>
</compile_context>

<pallas_src>
import functools

import jax
import jax.numpy as jnp
from jax import lax
from jax.experimental import pallas as pl
from jax.experimental.pallas import tpu as pltpu

LANE = 128


def _round_up(n, m):
    return ((n + m - 1) // m) * m


# ----------------------------------------------------------------------------
# Pallas kernel: fused (BN-folded GCNConv -> ReLU -> GCNConv -> log_softmax).
# All inputs are lane-padded; matmul operands bf16, accumulation f32.
# ----------------------------------------------------------------------------
def gcn_kernel(x_ref, adj_ref, w1_ref, s1_ref, b1_ref, w2_ref, b2_ref, out_ref):
    x = x_ref[...]                                   # [Np, Fp] bf16
    adj = adj_ref[...]                               # [Np, Np] bf16

    # --- GCNConv 1 (BatchNorm folded):  A_hat @ (X @ W1' + s1) + b1 ---
    t1 = jnp.dot(x, w1_ref[...], preferred_element_type=jnp.float32) + s1_ref[...]
    h = jnp.dot(adj, t1.astype(jnp.bfloat16),
                preferred_element_type=jnp.float32) + b1_ref[...]

    # --- ReLU ---
    h = jnp.maximum(h, 0.0)

    # --- Dropout: identity in eval mode (self.training == False) ---
    # TODO(synk): training-mode dropout would use pltpu.prng_random_bits.

    # --- GCNConv 2:  A_hat @ (H @ W2) + b2 ---
    t2 = jnp.dot(h.astype(jnp.bfloat16), w2_ref[...],
                 preferred_element_type=jnp.float32)
    z = jnp.dot(adj, t2.astype(jnp.bfloat16),
                preferred_element_type=jnp.float32) + b2_ref[...]
    # padded class lanes carry b2 = -1e30 -> excluded from the softmax below.

    # --- log_softmax over dim=1 (class axis), f32 ---
    m = jnp.max(z, axis=1, keepdims=True)
    lse = jnp.log(jnp.sum(jnp.exp(z - m), axis=1, keepdims=True)) + m
    out_ref[...] = z - lse


# ----------------------------------------------------------------------------
# Dense symmetric-normalized adjacency (torch_geometric gcn_norm semantics),
# built directly into the padded (Np, Np) buffer and cast to bf16 once.
# ----------------------------------------------------------------------------
def build_norm_adj_padded(edge_index, num_nodes, num_nodes_padded):
    src, dst = edge_index[0], edge_index[1]
    loop = jnp.arange(num_nodes, dtype=edge_index.dtype)      # add self loops
    src = jnp.concatenate([src, loop])
    dst = jnp.concatenate([dst, loop])
    adj = jnp.zeros((num_nodes_padded, num_nodes_padded),
                    jnp.float32).at[dst, src].add(1.0)
    deg = jnp.sum(adj, axis=1)                                 # padded rows: 0
    dinv = jnp.where(deg > 0, lax.rsqrt(deg), 0.0)
    return (adj * dinv[:, None] * dinv[None, :]).astype(jnp.bfloat16)


# ----------------------------------------------------------------------------
# Wrapper: BN fold, lane padding, bf16 cast, pallas_call, un-pad.
# ----------------------------------------------------------------------------
@functools.partial(jax.jit, static_argnames=("num_nodes",))
def gcn_simple_forward(x, edge_index, params, num_nodes):
    gamma, beta, mean, var, w1, b1, w2, b2 = params
    N, F = x.shape
    H = w1.shape[1]
    C = w2.shape[1]

    # --- fold eval-mode BatchNorm1d into the first GCN layer (exact) ---
    eps = 1e-5
    scale = gamma * lax.rsqrt(var + eps)                      # [F]
    w1_eff = w1 * scale[:, None]                              # [F, H]
    s1 = (beta - mean * scale) @ w1                           # [H] pre-agg shift

    # --- lane padding (N also to 128: adj lane axis + contraction depth) ---
    Np = _round_up(N, LANE)
    Fp = _round_up(F, LANE)
    Hp = _round_up(H, LANE)
    Cp = _round_up(C, LANE)

    adjp = build_norm_adj_padded(edge_index, num_nodes, Np)   # [Np, Np] bf16
    xp = jnp.zeros((Np, Fp), jnp.bfloat16).at[:N, :F].set(x.astype(jnp.bfloat16))
    w1p = jnp.zeros((Fp, Hp), jnp.bfloat16).at[:F, :H].set(w1_eff.astype(jnp.bfloat16))
    s1p = jnp.zeros((1, Hp), jnp.float32).at[0, :H].set(s1)
    b1p = jnp.zeros((1, Hp), jnp.float32).at[0, :H].set(b1)
    w2p = jnp.zeros((Hp, Cp), jnp.bfloat16).at[:H, :C].set(w2.astype(jnp.bfloat16))
    # padded class lanes get a huge negative bias -> drop out of log_softmax
    b2p = jnp.full((1, Cp), -1e30, jnp.float32).at[0, :C].set(b2)

    # --- cost estimate (advisory, helps XLA schedule around the custom call) --
    flops = 2 * Np * (Fp * Hp + Np * Hp + Hp * Cp + Np * Cp)
    transcendentals = Np * Cp + Np                            # exp + log
    io_bytes = (xp.size * 2 + adjp.size * 2 + w1p.size * 2 + w2p.size * 2
                + s1p.size * 4 + b1p.size * 4 + b2p.size * 4 + Np * Cp * 4)
    cost = pl.CostEstimate(flops=flops, transcendentals=transcendentals,
                           bytes_accessed=io_bytes)

    # --- VMEM limit sized to the actual working set (not a blanket request) --
    interm_bytes = 4 * Np * max(Hp, Cp) * 4                   # t1, h, t2, z (f32)
    vmem_limit = min(max(2 * io_bytes + interm_bytes + (4 << 20), 32 << 20),
                     100 << 20)

    full = lambda shape: pl.BlockSpec(shape, lambda: (0,) * len(shape))

    out = pl.pallas_call(
        gcn_kernel,
        out_shape=jax.ShapeDtypeStruct((Np, Cp), jnp.float32),
        in_specs=[
            full((Np, Fp)),   # x
            full((Np, Np)),   # adj
            full((Fp, Hp)),   # W1'
            full((1, Hp)),    # s1 (folded BN shift, pre-aggregation)
            full((1, Hp)),    # b1
            full((Hp, Cp)),   # W2
            full((1, Cp)),    # b2 (+ -1e30 class-padding mask)
        ],
        out_specs=full((Np, Cp)),
        cost_estimate=cost,
        compiler_params=pltpu.CompilerParams(vmem_limit_bytes=vmem_limit),
    )(xp, adjp, w1p, s1p, b1p, w2p, b2p)

    return out[:N, :C]


# ----------------------------------------------------------------------------
# Deterministic parameter init + run
# ----------------------------------------------------------------------------
def init_params(key, num_features, hidden_channels, num_classes):
    k1, k2, k3, k4, k5, k6 = jax.random.split(key, 6)
    gamma = 1.0 + 0.1 * jax.random.normal(k1, (num_features,), jnp.float32)
    beta = 0.1 * jax.random.normal(k2, (num_features,), jnp.float32)
    mean = 0.05 * jax.random.normal(k3, (num_features,), jnp.float32)
    var = jnp.abs(1.0 + 0.1 * jax.random.normal(k4, (num_features,), jnp.float32))
    w1 = jax.random.normal(k5, (num_features, hidden_channels), jnp.float32) * (
        (2.0 / (num_features + hidden_channels)) ** 0.5)
    b1 = jnp.zeros((hidden_channels,), jnp.float32)
    w2 = jax.random.normal(k6, (hidden_channels, num_classes), jnp.float32) * (
        (2.0 / (hidden_channels + num_classes)) ** 0.5)
    b2 = jnp.zeros((num_classes,), jnp.float32)
    return (gamma, beta, mean, var, w1, b1, w2, b2)


if __name__ == "__main__":
    num_nodes = 64
    num_features = 32
    hidden_channels = 32
    num_classes = 8
    num_edges = 128

    key = jax.random.PRNGKey(0)
    kx, ke, kp = jax.random.split(key, 3)

    x = jax.random.normal(kx, (num_nodes, num_features), jnp.float32)
    edge_index = jax.random.randint(ke, (2, num_edges), 0, num_nodes, jnp.int32)
    params = init_params(kp, num_features, hidden_channels, num_classes)

    out = gcn_simple_forward(x, edge_index, params, num_nodes=num_nodes)
    out = jax.block_until_ready(out)

    assert out.shape == (num_nodes, num_classes)
    # rows of log_softmax must exp-sum to 1
    assert bool(jnp.allclose(jnp.exp(out).sum(axis=1), 1.0, atol=1e-4))
    print("KERNEL_OK")
</pallas_src>

<mosaic_0001>
module attributes {stable_mosaic.version = 11 : i64} {
  func.func private @main(%arg0: i32) attributes {dimension_semantics = [#tpu.dimension_semantics<core_parallel>], iteration_bounds = array<i64: 2>, tpu.core_type = #tpu.core_type<sc_scalar_subcore>, window_params = []} {
    return
  }
}

module attributes {stable_mosaic.version = 11 : i64} {
  func.func private @main(%arg0: i32) attributes {dimension_semantics = [#tpu.dimension_semantics<core_parallel>], iteration_bounds = array<i64: 2>, tpu.core_type = #tpu.core_type<sc_scalar_subcore>, window_params = []} {
    return
  }
}

module attributes {stable_mosaic.version = 11 : i64} {
  func.func @gcn_kernel(%arg0: memref<128x128xbf16, #tpu.memory_space<vmem>>, %arg1: memref<128x128xbf16, #tpu.memory_space<vmem>>, %arg2: memref<128x128xbf16, #tpu.memory_space<vmem>>, %arg3: memref<1x128xf32, #tpu.memory_space<vmem>>, %arg4: memref<1x128xf32, #tpu.memory_space<vmem>>, %arg5: memref<128x128xbf16, #tpu.memory_space<vmem>>, %arg6: memref<1x128xf32, #tpu.memory_space<vmem>>, %arg7: memref<128x128xf32, #tpu.memory_space<vmem>>) attributes {dimension_semantics = [], scalar_prefetch = 0 : i64, scratch_operands = 0 : i64, tpu.core_type = #tpu.core_type<tc>} {
    %c0 = arith.constant 0 : index
    %c0_0 = arith.constant 0 : index
    %0 = vector.load %arg0[%c0, %c0_0] : memref<128x128xbf16, #tpu.memory_space<vmem>>, vector<128x128xbf16>
    %c0_1 = arith.constant 0 : index
    %c0_2 = arith.constant 0 : index
    %1 = vector.load %arg1[%c0_1, %c0_2] : memref<128x128xbf16, #tpu.memory_space<vmem>>, vector<128x128xbf16>
    %c0_3 = arith.constant 0 : index
    %c0_4 = arith.constant 0 : index
    %2 = vector.load %arg2[%c0_3, %c0_4] : memref<128x128xbf16, #tpu.memory_space<vmem>>, vector<128x128xbf16>
    %cst = arith.constant dense<0.000000e+00> : vector<128x128xf32>
    %3 = tpu.matmul %0, %2, %cst {dimension_numbers = #tpu.dot_dimension_numbers<[1], [0], [0], [1], [0, 0, 1, 1], [], []>} : vector<128x128xbf16>, vector<128x128xbf16>, vector<128x128xf32> -> vector<128x128xf32>
    %c0_5 = arith.constant 0 : index
    %c0_6 = arith.constant 0 : index
    %4 = vector.load %arg3[%c0_5, %c0_6] : memref<1x128xf32, #tpu.memory_space<vmem>>, vector<1x128xf32>
    %5 = vector.broadcast %4 : vector<1x128xf32> to vector<128x128xf32>
    %6 = arith.addf %3, %5 : vector<128x128xf32>
    %7 = arith.truncf %6 : vector<128x128xf32> to vector<128x128xbf16>
    %cst_7 = arith.constant dense<0.000000e+00> : vector<128x128xf32>
    %8 = tpu.matmul %1, %7, %cst_7 {dimension_numbers = #tpu.dot_dimension_numbers<[1], [0], [0], [1], [0, 0, 1, 1], [], []>} : vector<128x128xbf16>, vector<128x128xbf16>, vector<128x128xf32> -> vector<128x128xf32>
    %c0_8 = arith.constant 0 : index
    %c0_9 = arith.constant 0 : index
    %9 = vector.load %arg4[%c0_8, %c0_9] : memref<1x128xf32, #tpu.memory_space<vmem>>, vector<1x128xf32>
    %10 = vector.broadcast %9 : vector<1x128xf32> to vector<128x128xf32>
    %11 = arith.addf %8, %10 : vector<128x128xf32>
    %cst_10 = arith.constant 0.000000e+00 : f32
    %12 = vector.broadcast %cst_10 : f32 to vector<128x128xf32>
    %13 = arith.maximumf %11, %12 : vector<128x128xf32>
    %14 = arith.truncf %13 : vector<128x128xf32> to vector<128x128xbf16>
    %c0_11 = arith.constant 0 : index
    %c0_12 = arith.constant 0 : index
    %15 = vector.load %arg5[%c0_11, %c0_12] : memref<128x128xbf16, #tpu.memory_space<vmem>>, vector<128x128xbf16>
    %cst_13 = arith.constant dense<0.000000e+00> : vector<128x128xf32>
    %16 = tpu.matmul %14, %15, %cst_13 {dimension_numbers = #tpu.dot_dimension_numbers<[1], [0], [0], [1], [0, 0, 1, 1], [], []>} : vector<128x128xbf16>, vector<128x128xbf16>, vector<128x128xf32> -> vector<128x128xf32>
    %17 = arith.truncf %16 : vector<128x128xf32> to vector<128x128xbf16>
    %cst_14 = arith.constant dense<0.000000e+00> : vector<128x128xf32>
    %18 = tpu.matmul %1, %17, %cst_14 {dimension_numbers = #tpu.dot_dimension_numbers<[1], [0], [0], [1], [0, 0, 1, 1], [], []>} : vector<128x128xbf16>, vector<128x128xbf16>, vector<128x128xf32> -> vector<128x128xf32>
    %c0_15 = arith.constant 0 : index
    %c0_16 = arith.constant 0 : index
    %19 = vector.load %arg6[%c0_15, %c0_16] : memref<1x128xf32, #tpu.memory_space<vmem>>, vector<1x128xf32>
    %20 = vector.broadcast %19 : vector<1x128xf32> to vector<128x128xf32>
    %21 = arith.addf %18, %20 : vector<128x128xf32>
    %cst_17 = arith.constant dense<0xFF800000> : vector<128xf32>
    %22 = vector.multi_reduction <maximumf>, %21, %cst_17 [1] : vector<128x128xf32> to vector<128xf32>
    %23 = vector.shape_cast %22 : vector<128xf32> to vector<128x1xf32>
    %24 = vector.broadcast %23 : vector<128x1xf32> to vector<128x128xf32>
    %25 = arith.subf %21, %24 : vector<128x128xf32>
    %26 = math.exp %25 : vector<128x128xf32>
    %cst_18 = arith.constant dense<0.000000e+00> : vector<128xf32>
    %27 = vector.multi_reduction <add>, %26, %cst_18 [1] : vector<128x128xf32> to vector<128xf32>
    %28 = vector.shape_cast %27 : vector<128xf32> to vector<128x1xf32>
    %29 = math.log %28 : vector<128x1xf32>
    %30 = arith.addf %29, %23 : vector<128x1xf32>
    %31 = vector.broadcast %30 : vector<128x1xf32> to vector<128x128xf32>
    %32 = arith.subf %21, %31 : vector<128x128xf32>
    %c0_19 = arith.constant 0 : index
    %c0_20 = arith.constant 0 : index
    %33 = vector.load %arg7[%c0_19, %c0_20] : memref<128x128xf32, #tpu.memory_space<vmem>>, vector<128x128xf32>
    tpu.vector_store %arg7[%c0_19, %c0_20], %32 {strides = array<i32>} : memref<128x128xf32, #tpu.memory_space<vmem>>, vector<128x128xf32>,
    return
  }
}

</mosaic_0001>

<bundles_post_ra>
// kernel: gcn_simple_forward.1
= control target key start
LH: loop header
LB: loop body
LE: loop exit
PB: predicated region body
PF: predicated region fallthrough
CT: control target
= control target key end

     0   :  { %s1620_s2 = inlined_call_operand.vmem [shape: bf16[128,128], index: 2, kind: input, shape index: {}]   ;;  %s1621_s0 = inlined_call_operand.vmem [shape: bf16[128,128], index: 0, kind: input, shape index: {}]   ;;  %s1622_s1 = inlined_call_operand.vmem [shape: bf16[128,128], index: 1, kind: input, shape index: {}]   ;;  %s1623_s5 = inlined_call_operand.vmem [shape: bf16[128,128], index: 5, kind: input, shape index: {}]   ;;  %s1624_s3 = inlined_call_operand.vmem [shape: f32[1,128], index: 3, kind: input, shape index: {}]   ;;  %s1625_s4 = inlined_call_operand.vmem [shape: f32[1,128], index: 4, kind: input, shape index: {}]   ;;  %s1626_s6 = inlined_call_operand.vmem [shape: f32[1,128], index: 6, kind: input, shape index: {}]   ;;  %s1627_s7 = inlined_call_operand.vmem [shape: f32[128,128], index: 7, kind: output, shape index: {}]  }
   0x1   :  { %v1155_v0 = vld [vmem:[%s1620_s2] sm:$0xff]   ;;  %v1156_v1 = vld [vmem:[%s1620_s2 + $0x8] sm:$0xff]   ;;  %v1157_v2 = vld [vmem:[%s1620_s2 + $0x10] sm:$0xff]  }
   0x2   :  { %1027 = vmatprep.subr.bf16.mxu0 %v1155_v0  ;;  %v1158_v3 = vld [vmem:[%s1620_s2 + $0x18] sm:$0xff]   ;;  %v1163_v4 = vld [vmem:[%s1621_s0] sm:$0xff]   ;;  %v1160_v6 = vld [vmem:[%s1620_s2 + $0x28] sm:$0xff]  }
   0x3   :  { %1028 = vmatpush3.bf16.msra.mxu0 %v1155_v0  ;;  %1043 = vmatprep.mubr.bf16.mxu0 %v1163_v4  ;;  %v1159_v5 = vld [vmem:[%s1620_s2 + $0x20] sm:$0xff]   ;;  %v1161_v7 = vld [vmem:[%s1620_s2 + $0x30] sm:$0xff]   ;;  %v1162_v8 = vld [vmem:[%s1620_s2 + $0x38] sm:$0xff]  }
   0x4   :  { %1029 = vmatprep.subr.bf16.mxu0 %v1156_v1  ;;  %v1164_v9 = vld [vmem:[%s1621_s0 + $0x8] sm:$0xff]   ;;  %v1165_v10 = vld [vmem:[%s1621_s0 + $0x10] sm:$0xff]   ;;  %v1166_v11 = vld [vmem:[%s1621_s0 + $0x18] sm:$0xff]  }
   0x5   :  { %v1167_v12 = vld [vmem:[%s1621_s0 + $0x20] sm:$0xff]   ;;  %v1168_v13 = vld [vmem:[%s1621_s0 + $0x28] sm:$0xff]   ;;  %v1169_v14 = vld [vmem:[%s1621_s0 + $0x30] sm:$0xff]  }
   0x6   :  { %v1170_v15 = vld [vmem:[%s1621_s0 + $0x38] sm:$0xff]   ;;  %v1342_v16 = vld [vmem:[%s1622_s1] sm:$0xff]   ;;  %v1180_v18 = vld [vmem:[%s1623_s5 + $0x8] sm:$0xff]  }
   0x7   :  { %1030 = vmatpush3.bf16.msra.mxu0 %v1156_v1  ;;  %1075 = vmatprep.mubr.bf16.mxu1 %v1342_v16  ;;  %v1179_v17 = vld [vmem:[%s1623_s5] sm:$0xff]   ;;  %v1181_v19 = vld [vmem:[%s1623_s5 + $0x10] sm:$0xff]   ;;  %v1182_v20 = vld [vmem:[%s1623_s5 + $0x18] sm:$0xff]  }
   0x8   :  { %1031 = vmatprep.subr.bf16.mxu0 %v1157_v2  ;;  %v1183_v21 = vld [vmem:[%s1623_s5 + $0x20] sm:$0xff]   ;;  %v1184_v22 = vld [vmem:[%s1623_s5 + $0x28] sm:$0xff]   ;;  %v1374_v1 = vld [vmem:[%s1622_s1 + $0x10] sm:$0xff]  }
   0x9   :  { %v928_v24 = vld [vmem:[%s1624_s3] ss:$0 sm:$0xff]  ;;  %v1369_v0 = vld [vmem:[%s1622_s1 + $0x8] sm:$0xff]  }
   0xa   :  { %v1393_v4 = vld [vmem:[%s1622_s1 + $0x28] sm:$0xff]  }
   0xb   :  { %1032 = vmatpush3.bf16.msra.mxu0 %v1157_v2  ;;  %v1381_v2 = vld [vmem:[%s1622_s1 + $0x18] sm:$0xff]  }
   0xc   :  { %1033 = vmatprep.subr.bf16.mxu0 %v1158_v3 }
   0xf   :  { %1034 = vmatpush3.bf16.msra.mxu0 %v1158_v3  ;;  %v1386_v3 = vld [vmem:[%s1622_s1 + $0x20] sm:$0xff]  }
  0x10   :  { %1035 = vmatprep.subr.bf16.mxu0 %v1159_v5 }
  0x13   :  { %1036 = vmatpush3.bf16.msra.mxu0 %v1159_v5  ;;  %v1398_v5 = vld [vmem:[%s1622_s1 + $0x30] sm:$0xff]  }
  0x14   :  { %1037 = vmatprep.subr.bf16.mxu0 %v1160_v6 }
  0x17   :  { %1038 = vmatpush3.bf16.msra.mxu0 %v1160_v6  ;;  %v1405_v6 = vld [vmem:[%s1622_s1 + $0x38] sm:$0xff]  }
  0x18   :  { %1039 = vmatprep.subr.bf16.mxu0 %v1161_v7 }
  0x1b   :  { %1040 = vmatpush3.bf16.msra.mxu0 %v1161_v7  ;;  %v1185_v7 = vld [vmem:[%s1623_s5 + $0x30] sm:$0xff]  }
  0x1c   :  { %1041 = vmatprep.subr.bf16.mxu0 %v1162_v8 }
  0x1f   :  { %1042 = vmatpush3.bf16.msra.mxu0 %v1162_v8  ;;  %v1186_v8 = vld [vmem:[%s1623_s5 + $0x38] sm:$0xff]  }
  0x20   :  { %1091 = vmatprep.subr.bf16.mxu0 %v1179_v17 }
  0x22   :  { %1044 = vmatmul.mubr.bf16.vlgmr.msra.gmra.mrb[0].mxu0 %v1164_v9  ;;  %v945_v9 = vld [vmem:[%s1625_s4] ss:$0 sm:$0xff] }
  0x23   :  { %1047 = vmatprep.mubr.bf16.mxu0 %v1165_v10  ;;  %1092 = vmatpush3.bf16.msra.mxu0 %v1179_v17 }
  0x24   :  { %1093 = vmatprep.subr.bf16.mxu0 %v1180_v18 }
  0x27   :  { %1094 = vmatpush3.bf16.msra.mxu0 %v1180_v18 }
  0x28   :  { %1095 = vmatprep.subr.bf16.mxu0 %v1181_v19 }
  0x2a   :  { %1048 = vmatmul.mubr.bf16.gmra.mrb[4].mxu0 %v1166_v11 }
  0x2b   :  { %1051 = vmatprep.mubr.bf16.mxu0 %v1167_v12  ;;  %1096 = vmatpush3.bf16.msra.mxu0 %v1181_v19 }
  0x2c   :  { %1097 = vmatprep.subr.bf16.mxu0 %v1182_v20 }
  0x2f   :  { %1098 = vmatpush3.bf16.msra.mxu0 %v1182_v20 }
  0x30   :  { %1099 = vmatprep.subr.bf16.mxu0 %v1183_v21 }
  0x32   :  { %1052 = vmatmul.mubr.bf16.gmra.mrb[8].mxu0 %v1168_v13 }
  0x33   :  { %1055 = vmatprep.mubr.bf16.mxu0 %v1169_v14  ;;  %1100 = vmatpush3.bf16.msra.mxu0 %v1183_v21 }
  0x34   :  { %1101 = vmatprep.subr.bf16.mxu0 %v1184_v22 }
  0x37   :  { %1102 = vmatpush3.bf16.msra.mxu0 %v1184_v22 }
  0x38   :  { %1103 = vmatprep.subr.bf16.mxu0 %v1185_v7 }
  0x3a   :  { %1056 = vmatmul.mubr.bf16.gmra.mrb[12].mxu0 %v1170_v15 }
  0x3b   :  { %1104 = vmatpush3.bf16.msra.mxu0 %v1185_v7 }
  0x3c   :  { %1105 = vmatprep.subr.bf16.mxu0 %v1186_v8 }
  0x3f   :  { %1106 = vmatpush3.bf16.msra.mxu0 %v1186_v8 }
  0xf5   :  { %v1045_v23 = vpop.f32.mrb[0].mxu0 }
  0xf6   :  { %v212_v25 = vpop.f32.mrb[1].mxu0  ;;  %v221_v27 = vadd.f32 %v1045_v23, %v928_v24 }
  0xf7   :  { %v1046_v26 = vpop.f32.mrb[2].mxu0  ;;  %v213_v30 = vadd.f32 %v928_v24, %v212_v25 }
  0xf8   :  { %v224_v28 = vadd.f32 %v1046_v26, %v928_v24  ;;  %v215_v29 = vpop.f32.mrb[3].mxu0 }
  0xf9   :  { %v216_v31 = vadd.f32 %v928_v24, %v215_v29 }
  0xfa   :  { %v276_v32 = vpack.c.bf16 %v224_v28, %v221_v27 }
  0xfb   :  { %v275_v33 = vpack.c.bf16 %v216_v31, %v213_v30 }
  0xfd   :  { %v1049_v34 = vpop.f32.mrb[4].mxu0  ;;  %1059 = vmatprep.subr.bf16.mxu1 %v275_v33 }
  0xfe   :  { %v228_v35 = vpop.f32.mrb[5].mxu0  ;;  %1060 = vmatpush3.bf16.msra.mxu1 %v275_v33  ;;  %v237_v37 = vadd.f32 %v1049_v34, %v928_v24 }
  0xff   :  { %v1050_v36 = vpop.f32.mrb[6].mxu0  ;;  %1061 = vmatprep.subr.bf16.mxu1 %v276_v32  ;;  %v229_v40 = vadd.f32 %v928_v24, %v228_v35 }
 0x100   :  { %v240_v38 = vadd.f32 %v1050_v36, %v928_v24  ;;  %v231_v39 = vpop.f32.mrb[7].mxu0 }
 0x101   :  { %v232_v41 = vadd.f32 %v928_v24, %v231_v39 }
 0x102   :  { %v278_v42 = vpack.c.bf16 %v240_v38, %v237_v37  ;;  %1062 = vmatpush3.bf16.msra.mxu1 %v276_v32 }
 0x103   :  { %v277_v43 = vpack.c.bf16 %v232_v41, %v229_v40 }
 0x105   :  { %v1053_v44 = vpop.f32.mrb[8].mxu0  ;;  %1063 = vmatprep.subr.bf16.mxu1 %v277_v43 }
 0x106   :  { %v244_v45 = vpop.f32.mrb[9].mxu0  ;;  %1064 = vmatpush3.bf16.msra.mxu1 %v277_v43  ;;  %v253_v47 = vadd.f32 %v1053_v44, %v928_v24 }
 0x107   :  { %v1054_v46 = vpop.f32.mrb[10].mxu0  ;;  %1065 = vmatprep.subr.bf16.mxu1 %v278_v42  ;;  %v245_v50 = vadd.f32 %v928_v24, %v244_v45 }
 0x108   :  { %v256_v48 = vadd.f32 %v1054_v46, %v928_v24  ;;  %v247_v49 = vpop.f32.mrb[11].mxu0 }
 0x109   :  { %v248_v51 = vadd.f32 %v928_v24, %v247_v49 }
 0x10a   :  { %v280_v52 = vpack.c.bf16 %v256_v48, %v253_v47  ;;  %1066 = vmatpush3.bf16.msra.mxu1 %v278_v42 }
 0x10b   :  { %v279_v53 = vpack.c.bf16 %v248_v51, %v245_v50 }
 0x10d   :  { %v1057_v54 = vpop.f32.mrb[12].mxu0  ;;  %1067 = vmatprep.subr.bf16.mxu1 %v279_v53 }
 0x10e   :  { %v260_v55 = vpop.f32.mrb[13].mxu0  ;;  %1068 = vmatpush3.bf16.msra.mxu1 %v279_v53  ;;  %v269_v57 = vadd.f32 %v1057_v54, %v928_v24 }
 0x10f   :  { %v1058_v56 = vpop.f32.mrb[14].mxu0  ;;  %1069 = vmatprep.subr.bf16.mxu1 %v280_v52  ;;  %v261_v60 = vadd.f32 %v928_v24, %v260_v55 }
 0x110   :  { %v272_v58 = vadd.f32 %v1058_v56, %v928_v24  ;;  %v263_v59 = vpop.f32.mrb[15].mxu0 }
 0x111   :  { %v264_v61 = vadd.f32 %v928_v24, %v263_v59 }
 0x112   :  { %v282_v62 = vpack.c.bf16 %v272_v58, %v269_v57  ;;  %1070 = vmatpush3.bf16.msra.mxu1 %v280_v52 }
 0x113   :  { %v281_v63 = vpack.c.bf16 %v264_v61, %v261_v60 }
 0x115   :  { %1071 = vmatprep.subr.bf16.mxu1 %v281_v63 }
 0x116   :  { %1072 = vmatpush3.bf16.msra.mxu1 %v281_v63 }
 0x117   :  { %1073 = vmatprep.subr.bf16.mxu1 %v282_v62 }
 0x11a   :  { %1074 = vmatpush3.bf16.msra.mxu1 %v282_v62 }
 0x11d   :  { %1076 = vmatmul.mubr.bf16.vlgmr.msra.gmra.mrb[0].mxu1 %v1369_v0 }
 0x11e   :  { %1079 = vmatprep.mubr.bf16.mxu1 %v1374_v1 }
 0x125   :  { %1080 = vmatmul.mubr.bf16.gmra.mrb[4].mxu1 %v1381_v2 }
 0x126   :  { %1083 = vmatprep.mubr.bf16.mxu1 %v1386_v3 }
 0x12d   :  { %1084 = vmatmul.mubr.bf16.gmra.mrb[8].mxu1 %v1393_v4 }
 0x12e   :  { %1087 = vmatprep.mubr.bf16.mxu1 %v1398_v5 }
 0x135   :  { %1088 = vmatmul.mubr.bf16.gmra.mrb[12].mxu1 %v1405_v6 }
 0x136   :  { %1139 = vmatprep.mubr.bf16.mxu1 %v1342_v16 }
 0x1f0   :  { %v1077_v10 = vpop.f32.mrb[0].mxu1 }
 0x1f1   :  { %v381_v11 = vadd.f32 %v1077_v10, %v945_v9  ;;  %v372_v12 = vpop.f32.mrb[1].mxu1 }
 0x1f2   :  { %v373_v13 = vadd.f32 %v945_v9, %v372_v12  ;;  %v1078_v14 = vpop.f32.mrb[2].mxu1 }
 0x1f3   :  { %v384_v15 = vadd.f32 %v1078_v14, %v945_v9  ;;  %v375_v16 = vpop.f32.mrb[3].mxu1  ;;  %v437_v18 = vmax.f32 %v381_v11, 0.0 }
 0x1f4   :  { %v376_v17 = vadd.f32 %v945_v9, %v375_v16  ;;  %v435_v20 = vmax.f32 %v373_v13, 0.0 }
 0x1f5   :  { %v438_v19 = vmax.f32 %v384_v15, 0.0 }
 0x1f6   :  { %v436_v21 = vmax.f32 %v376_v17, 0.0 }
 0x1f7   :  { %v452_v22 = vpack.c.bf16 %v438_v19, %v437_v18 }
 0x1f8   :  { %v451_v23 = vpack.c.bf16 %v436_v21, %v435_v20  ;;  %v1081_v24 = vpop.f32.mrb[4].mxu1 }
 0x1f9   :  { %v397_v25 = vadd.f32 %v1081_v24, %v945_v9  ;;  %v388_v26 = vpop.f32.mrb[5].mxu1 }
 0x1fa   :  { %v389_v27 = vadd.f32 %v945_v9, %v388_v26  ;;  %v1082_v28 = vpop.f32.mrb[6].mxu1  ;;  %1107 = vmatprep.mubr.bf16.mxu0 %v451_v23 }
 0x1fb   :  { %v400_v29 = vadd.f32 %v1082_v28, %v945_v9  ;;  %v391_v30 = vpop.f32.mrb[7].mxu1  ;;  %1108 = vmatmul.mubr.bf16.vlgmr.msra.gmra.mrb[16].mxu0 %v452_v22  ;;  %v441_v32 = vmax.f32 %v397_v25, 0.0 }
 0x1fc   :  { %v392_v31 = vadd.f32 %v945_v9, %v391_v30  ;;  %v439_v34 = vmax.f32 %v389_v27, 0.0 }
 0x1fd   :  { %v442_v33 = vmax.f32 %v400_v29, 0.0 }
 0x1fe   :  { %v440_v35 = vmax.f32 %v392_v31, 0.0 }
 0x1ff   :  { %v454_v36 = vpack.c.bf16 %v442_v33, %v441_v32  ;;  %v962_v33 = vld [vmem:[%s1626_s6] ss:$0 sm:$0xff] }
 0x200   :  { %v453_v37 = vpack.c.bf16 %v440_v35, %v439_v34  ;;  %v1085_v38 = vpop.f32.mrb[8].mxu1 }
 0x201   :  { %v413_v39 = vadd.f32 %v1085_v38, %v945_v9  ;;  %v404_v40 = vpop.f32.mrb[9].mxu1 }
 0x202   :  { %v405_v41 = vadd.f32 %v945_v9, %v404_v40  ;;  %v1086_v42 = vpop.f32.mrb[10].mxu1  ;;  %1111 = vmatprep.mubr.bf16.mxu0 %v453_v37 }
 0x203   :  { %v416_v43 = vadd.f32 %v1086_v42, %v945_v9  ;;  %v407_v44 = vpop.f32.mrb[11].mxu1  ;;  %1112 = vmatmul.mubr.bf16.gmra.mrb[20].mxu0 %v454_v36  ;;  %v445_v46 = vmax.f32 %v413_v39, 0.0 }
 0x204   :  { %v408_v45 = vadd.f32 %v945_v9, %v407_v44  ;;  %v443_v48 = vmax.f32 %v405_v41, 0.0 }
 0x205   :  { %v446_v47 = vmax.f32 %v416_v43, 0.0 }
 0x206   :  { %v444_v49 = vmax.f32 %v408_v45, 0.0 }
 0x207   :  { %v456_v50 = vpack.c.bf16 %v446_v47, %v445_v46 }
 0x208   :  { %v455_v51 = vpack.c.bf16 %v444_v49, %v443_v48  ;;  %v1089_v52 = vpop.f32.mrb[12].mxu1 }
 0x209   :  { %v429_v53 = vadd.f32 %v1089_v52, %v945_v9  ;;  %v420_v54 = vpop.f32.mrb[13].mxu1 }
 0x20a   :  { %v421_v55 = vadd.f32 %v945_v9, %v420_v54  ;;  %v1090_v56 = vpop.f32.mrb[14].mxu1  ;;  %1115 = vmatprep.mubr.bf16.mxu0 %v455_v51 }
 0x20b   :  { %v432_v57 = vadd.f32 %v1090_v56, %v945_v9  ;;  %v423_v58 = vpop.f32.mrb[15].mxu1  ;;  %1116 = vmatmul.mubr.bf16.gmra.mrb[24].mxu0 %v456_v50  ;;  %v449_v60 = vmax.f32 %v429_v53, 0.0 }
 0x20c   :  { %v424_v59 = vadd.f32 %v945_v9, %v423_v58  ;;  %v447_v62 = vmax.f32 %v421_v55, 0.0 }
 0x20d   :  { %v450_v61 = vmax.f32 %v432_v57, 0.0 }
 0x20e   :  { %v448_v63 = vmax.f32 %v424_v59, 0.0 }
 0x20f   :  { %v458_v7 = vpack.c.bf16 %v450_v61, %v449_v60 }
 0x210   :  { %v457_v8 = vpack.c.bf16 %v448_v63, %v447_v62 }
 0x212   :  { %1119 = vmatprep.mubr.bf16.mxu0 %v457_v8 }
 0x213   :  { %1120 = vmatmul.mubr.bf16.gmra.mrb[28].mxu0 %v458_v7 }
 0x2ce   :  { %v1109_v10 = vpop.f32.mrb[16].mxu0 }
 0x2cf   :  { %v557_v11 = vpop.f32.mrb[17].mxu0 }
 0x2d0   :  { %v1110_v12 = vpop.f32.mrb[18].mxu0 }
 0x2d1   :  { %v621_v13 = vpack.c.bf16 %v1110_v12, %v1109_v10  ;;  %v560_v14 = vpop.f32.mrb[19].mxu0 }
 0x2d2   :  { %v620_v15 = vpack.c.bf16 %v560_v14, %v557_v11 }
 0x2d4   :  { %1123 = vmatprep.subr.bf16.mxu1 %v620_v15 }
 0x2d5   :  { %1124 = vmatpush3.bf16.msra.mxu1 %v620_v15 }
 0x2d6   :  { %v1113_v16 = vpop.f32.mrb[20].mxu0  ;;  %1125 = vmatprep.subr.bf16.mxu1 %v621_v13 }
 0x2d7   :  { %v573_v17 = vpop.f32.mrb[21].mxu0 }
 0x2d8   :  { %v1114_v9 = vpop.f32.mrb[22].mxu0 }
 0x2d9   :  { %v623_v18 = vpack.c.bf16 %v1114_v9, %v1113_v16  ;;  %v576_v19 = vpop.f32.mrb[23].mxu0  ;;  %1126 = vmatpush3.bf16.msra.mxu1 %v621_v13 }
 0x2da   :  { %v622_v20 = vpack.c.bf16 %v576_v19, %v573_v17 }
 0x2dc   :  { %1127 = vmatprep.subr.bf16.mxu1 %v622_v20 }
 0x2dd   :  { %1128 = vmatpush3.bf16.msra.mxu1 %v622_v20 }
 0x2de   :  { %v1117_v21 = vpop.f32.mrb[24].mxu0  ;;  %1129 = vmatprep.subr.bf16.mxu1 %v623_v18 }
 0x2df   :  { %v589_v22 = vpop.f32.mrb[25].mxu0 }
 0x2e0   :  { %v1118_v23 = vpop.f32.mrb[26].mxu0 }
 0x2e1   :  { %v625_v24 = vpack.c.bf16 %v1118_v23, %v1117_v21  ;;  %v592_v25 = vpop.f32.mrb[27].mxu0  ;;  %1130 = vmatpush3.bf16.msra.mxu1 %v623_v18 }
 0x2e2   :  { %v624_v26 = vpack.c.bf16 %v592_v25, %v589_v22 }
 0x2e4   :  { %1131 = vmatprep.subr.bf16.mxu1 %v624_v26 }
 0x2e5   :  { %1132 = vmatpush3.bf16.msra.mxu1 %v624_v26 }
 0x2e6   :  { %v1121_v27 = vpop.f32.mrb[28].mxu0  ;;  %1133 = vmatprep.subr.bf16.mxu1 %v625_v24 }
 0x2e7   :  { %v605_v28 = vpop.f32.mrb[29].mxu0 }
 0x2e8   :  { %v1122_v29 = vpop.f32.mrb[30].mxu0 }
 0x2e9   :  { %v627_v30 = vpack.c.bf16 %v1122_v29, %v1121_v27  ;;  %v608_v31 = vpop.f32.mrb[31].mxu0  ;;  %1134 = vmatpush3.bf16.msra.mxu1 %v625_v24 }
 0x2ea   :  { %v626_v32 = vpack.c.bf16 %v608_v31, %v605_v28 }
 0x2ec   :  { %1135 = vmatprep.subr.bf16.mxu1 %v626_v32 }
 0x2ed   :  { %1136 = vmatpush3.bf16.msra.mxu1 %v626_v32 }
 0x2ee   :  { %1137 = vmatprep.subr.bf16.mxu1 %v627_v30 }
 0x2f1   :  { %1138 = vmatpush3.bf16.msra.mxu1 %v627_v30 }
 0x2f4   :  { %1140 = vmatmul.mubr.bf16.vlgmr.msra.gmra.mrb[16].mxu1 %v1369_v0 }
 0x2f5   :  { %1143 = vmatprep.mubr.bf16.mxu1 %v1374_v1 }
 0x2fc   :  { %1144 = vmatmul.mubr.bf16.gmra.mrb[20].mxu1 %v1381_v2 }
 0x2fd   :  { %1147 = vmatprep.mubr.bf16.mxu1 %v1386_v3 }
 0x304   :  { %1148 = vmatmul.mubr.bf16.gmra.mrb[24].mxu1 %v1393_v4 }
 0x305   :  { %1151 = vmatprep.mubr.bf16.mxu1 %v1398_v5 }
 0x30c   :  { %1152 = vmatmul.mubr.bf16.gmra.mrb[28].mxu1 %v1405_v6 }
 0x3c7   :  { %v1141_v34 = vpop.f32.mrb[16].mxu1 }
 0x3c8   :  { %v1428_v35 = vadd.f32 %v1141_v34, %v962_v33  ;;  %v669_v0 = vpop.f32.mrb[17].mxu1 }
 0x3c9   :  { %v1430_v36 = vadd.f32 %v962_v33, %v669_v0  ;;  %v1142_v1 = vpop.f32.mrb[18].mxu1 }
 0x3ca   :  { %736 = vmax.xlane.f32.xlu1 %v1428_v35  ;;  %v672_v2 = vpop.f32.mrb[19].mxu1  ;;  %v1434_v3 = vadd.f32 %v1142_v1, %v962_v33 }
 0x3cb   :  { %732 = vmax.xlane.f32.xlu0 %v1430_v36  ;;  %v1436_v4 = vadd.f32 %v962_v33, %v672_v2 }
 0x3ce   :  { %738 = vmax.xlane.f32.xlu1 %v1434_v3 }
 0x3cf   :  { %v1145_v5 = vpop.f32.mrb[20].mxu1  ;;  %734 = vmax.xlane.f32.xlu0 %v1436_v4 }
 0x3d0   :  { %v1440_v6 = vadd.f32 %v1145_v5, %v962_v33  ;;  %v685_v37 = vpop.f32.mrb[21].mxu1 }
 0x3d1   :  { %v1146_v38 = vpop.f32.mrb[22].mxu1  ;;  %v1446_v41 = vadd.f32 %v962_v33, %v685_v37 }
 0x3d2   :  { %v1442_v39 = vadd.f32 %v1146_v38, %v962_v33  ;;  %v688_v40 = vpop.f32.mrb[23].mxu1 }
 0x3d3   :  { %744 = vmax.xlane.f32.xlu0 %v1440_v6  ;;  %v1448_v42 = vadd.f32 %v962_v33, %v688_v40 }
 0x3d4   :  { %746 = vmax.xlane.f32.xlu1 %v1442_v39 }
 0x3d7   :  { %v1149_v43 = vpop.f32.mrb[24].mxu1  ;;  %740 = vmax.xlane.f32.xlu0 %v1446_v41 }
 0x3d8   :  { %v1451_v44 = vadd.f32 %v1149_v43, %v962_v33  ;;  %v701_v45 = vpop.f32.mrb[25].mxu1  ;;  %742 = vmax.xlane.f32.xlu1 %v1448_v42 }
 0x3d9   :  { %v1150_v46 = vpop.f32.mrb[26].mxu1  ;;  %v1458_v49 = vadd.f32 %v962_v33, %v701_v45 }
 0x3da   :  { %v1454_v47 = vadd.f32 %v1150_v46, %v962_v33  ;;  %v704_v48 = vpop.f32.mrb[27].mxu1 }
 0x3db   :  { %752 = vmax.xlane.f32.xlu0 %v1451_v44  ;;  %v1460_v50 = vadd.f32 %v962_v33, %v704_v48 }
 0x3dc   :  { %754 = vmax.xlane.f32.xlu1 %v1454_v47 }
 0x3df   :  { %v1153_v51 = vpop.f32.mrb[28].mxu1  ;;  %748 = vmax.xlane.f32.xlu0 %v1458_v49 }
 0x3e0   :  { %v717_v52 = vpop.f32.mrb[29].mxu1  ;;  %750 = vmax.xlane.f32.xlu1 %v1460_v50  ;;  %v1469_v57 = vadd.f32 %v1153_v51, %v962_v33 }
 0x3e1   :  { %v1464_v53 = vadd.f32 %v962_v33, %v717_v52  ;;  %v1154_v54 = vpop.f32.mrb[30].mxu1 }
 0x3e2   :  { %v720_v55 = vpop.f32.mrb[31].mxu1  ;;  %v1472_v58 = vadd.f32 %v1154_v54, %v962_v33 }
 0x3e3   :  { %v1466_v56 = vadd.f32 %v962_v33, %v720_v55  ;;  %756 = vmax.xlane.f32.xlu0 %v1464_v53 }
 0x3e5   :  { %758 = vmax.xlane.f32.xlu1 %v1466_v56 }
 0x3e7   :  { %760 = vmax.xlane.f32.xlu0 %v1469_v57 }
 0x3e9   :  { %762 = vmax.xlane.f32.xlu1 %v1472_v58 }
 0x457   :  { %v1476_v59 = vpop.xlane.xlu1 %736 }
 0x458   :  { %v766_v60 = vsub.f32 %v1428_v35, %v1476_v59  ;;  %v1480_v61 = vpop.xlane.xlu0 %732 }
 0x459   :  { %v764_v62 = vsub.f32 %v1430_v36, %v1480_v61 }
 0x45a   :  { %v784_v63 = vmul.f32 1.442695, %v766_v60 }
 0x45b   :  { %v780_v7 = vmul.f32 1.442695, %v764_v62  ;;  %v1484_v8 = vpop.xlane.xlu1 %738 }
 0x45c   :  { %1187 = vpow2.f32 %v784_v63  ;;  %v767_v10 = vsub.f32 %v1434_v3, %v1484_v8  ;;  %v1488_v11 = vpop.xlane.xlu0 %734 }
 0x45d   :  { %v765_v12 = vsub.f32 %v1436_v4, %v1488_v11  ;;  %1189 = vpow2.f32 %v780_v7 }
 0x45e   :  { %v786_v13 = vmul.f32 1.442695, %v767_v10 }
 0x45f   :  { %v782_v14 = vmul.f32 1.442695, %v765_v12 }
 0x460   :  { %1191 = vpow2.f32 %v786_v13  ;;  %v1492_v15 = vpop.xlane.xlu0 %744 }
 0x461   :  { %v770_v16 = vsub.f32 %v1440_v6, %v1492_v15  ;;  %v1496_v17 = vpop.xlane.xlu1 %746  ;;  %1193 = vpow2.f32 %v782_v14 }
 0x462   :  { %v771_v9 = vsub.f32 %v1442_v39, %v1496_v17 }
 0x463   :  { %v792_v18 = vmul.f32 1.442695, %v770_v16 }
 0x464   :  { %v794_v19 = vmul.f32 1.442695, %v771_v9  ;;  %v1500_v20 = vpop.xlane.xlu0 %740 }
 0x465   :  { %1195 = vpow2.f32 %v792_v18  ;;  %v768_v21 = vsub.f32 %v1446_v41, %v1500_v20  ;;  %v1504_v22 = vpop.xlane.xlu1 %742 }
 0x466   :  { %v1188_v23 = vpop.eup %1187  ;;  %v769_v24 = vsub.f32 %v1448_v42, %v1504_v22  ;;  %1197 = vpow2.f32 %v794_v19 }
 0x467   :  { %v788_v25 = vmul.f32 1.442695, %v768_v21  ;;  %816 = vadd.xlane.f32.xlu0 %v1188_v23  ;;  %v1190_v28 = vpop.eup %1189 }
 0x468   :  { %v790_v26 = vmul.f32 1.442695, %v769_v24  ;;  %v1508_v27 = vpop.xlane.xlu0 %752 }
 0x469   :  { %1199 = vpow2.f32 %v788_v25  ;;  %v774_v29 = vsub.f32 %v1451_v44, %v1508_v27  ;;  %v1512_v30 = vpop.xlane.xlu1 %754 }
 0x46a   :  { %v1192_v31 = vpop.eup %1191  ;;  %v775_v32 = vsub.f32 %v1454_v47, %v1512_v30  ;;  %1201 = vpow2.f32 %v790_v26 }
 0x46b   :  { %v800_v33 = vmul.f32 1.442695, %v774_v29  ;;  %818 = vadd.xlane.f32.xlu1 %v1192_v31  ;;  %812 = vadd.xlane.f32.xlu0 %v1190_v28  ;;  %v1194_v5 = vpop.eup %1193 }
 0x46c   :  { %v802_v34 = vmul.f32 1.442695, %v775_v32  ;;  %v1516_v0 = vpop.xlane.xlu0 %748 }
 0x46d   :  { %1203 = vpow2.f32 %v800_v33  ;;  %v772_v1 = vsub.f32 %v1458_v49, %v1516_v0  ;;  %v1520_v2 = vpop.xlane.xlu1 %750 }
 0x46e   :  { %v773_v37 = vsub.f32 %v1460_v50, %v1520_v2  ;;  %1205 = vpow2.f32 %v802_v34 }
 0x46f   :  { %v1196_v38 = vpop.eup %1195  ;;  %v796_v40 = vmul.f32 1.442695, %v772_v1  ;;  %814 = vadd.xlane.f32.xlu1 %v1194_v5 }
 0x470   :  { %v798_v43 = vmul.f32 1.442695, %v773_v37  ;;  %824 = vadd.xlane.f32.xlu0 %v1196_v38  ;;  %v1524_v45 = vpop.xlane.xlu0 %756  ;;  %v1198_v48 = vpop.eup %1197 }
 0x471   :  { %1207 = vpow2.f32 %v796_v40  ;;  %v776_v46 = vsub.f32 %v1464_v53, %v1524_v45 }
 0x472   :  { %v1528_v51 = vpop.xlane.xlu1 %758  ;;  %1209 = vpow2.f32 %v798_v43 }
 0x473   :  { %v1200_v52 = vpop.eup %1199  ;;  %v804_v54 = vmul.f32 1.442695, %v776_v46  ;;  %v777_v55 = vsub.f32 %v1466_v56, %v1528_v51  ;;  %826 = vadd.xlane.f32.xlu1 %v1198_v48 }
 0x474   :  { %820 = vadd.xlane.f32.xlu0 %v1200_v52  ;;  %v1532_v60 = vpop.xlane.xlu0 %760  ;;  %v1202_v7 = vpop.eup %1201 }
 0x475   :  { %1211 = vpow2.f32 %v804_v54  ;;  %v806_v62 = vmul.f32 1.442695, %v777_v55  ;;  %v778_v63 = vsub.f32 %v1469_v57, %v1532_v60 }
 0x476   :  { %v1536_v10 = vpop.xlane.xlu1 %762 }
 0x477   :  { %v1204_v12 = vpop.eup %1203  ;;  %1213 = vpow2.f32 %v806_v62  ;;  %v808_v13 = vmul.f32 1.442695, %v778_v63  ;;  %v779_v14 = vsub.f32 %v1472_v58, %v1536_v10  ;;  %822 = vadd.xlane.f32.xlu1 %v1202_v7 }
 0x478   :  { %832 = vadd.xlane.f32.xlu0 %v1204_v12  ;;  %v1206_v9 = vpop.eup %1205 }
 0x479   :  { %1215 = vpow2.f32 %v808_v13  ;;  %v810_v16 = vmul.f32 1.442695, %v779_v14 }
 0x47b   :  { %v1208_v18 = vpop.eup %1207  ;;  %1217 = vpow2.f32 %v810_v16  ;;  %834 = vadd.xlane.f32.xlu1 %v1206_v9 }
 0x47c   :  { %828 = vadd.xlane.f32.xlu0 %v1208_v18  ;;  %v1210_v19 = vpop.eup %1209 }
 0x47f   :  { %v1212_v21 = vpop.eup %1211  ;;  %830 = vadd.xlane.f32.xlu1 %v1210_v19 }
 0x480   :  { %836 = vadd.xlane.f32.xlu0 %v1212_v21 }
 0x481   :  { %v1214_v23 = vpop.eup %1213 }
 0x483   :  { %v1216_v24 = vpop.eup %1215  ;;  %838 = vadd.xlane.f32.xlu1 %v1214_v23 }
 0x484   :  { %840 = vadd.xlane.f32.xlu0 %v1216_v24 }
 0x485   :  { %v1218_v25 = vpop.eup %1217 }
 0x487   :  { %842 = vadd.xlane.f32.xlu1 %v1218_v25 }
 0x4f4   :  { %v817_v26 = vpop.xlane.xlu0 %816 }
 0x4f5   :  { %1219 = vlog2.f32 %v817_v26 }
 0x4f8   :  { %v819_v28 = vpop.xlane.xlu1 %818  ;;  %v813_v29 = vpop.xlane.xlu0 %812 }
 0x4f9   :  { %1221 = vlog2.f32 %v819_v28 }
 0x4fa   :  { %1223 = vlog2.f32 %v813_v29 }
 0x4fc   :  { %v815_v31 = vpop.xlane.xlu1 %814 }
 0x4fd   :  { %1225 = vlog2.f32 %v815_v31  ;;  %v825_v32 = vpop.xlane.xlu0 %824 }
 0x4fe   :  { %1227 = vlog2.f32 %v825_v32 }
 0x4ff   :  { %v1220_v33 = vpop.eup %1219 }
 0x500   :  { %v849_v34 = vmul.f32 0.6931472, %v1220_v33  ;;  %v827_v1 = vpop.xlane.xlu1 %826 }
 0x501   :  { %1229 = vlog2.f32 %v827_v1  ;;  %v821_v5 = vpop.xlane.xlu0 %820 }
 0x502   :  { %v878_v37 = vadd.f32 %v849_v34, %v1476_v59  ;;  %1231 = vlog2.f32 %v821_v5 }
 0x503   :  { %v1222_v38 = vpop.eup %1221 }
 0x504   :  { %v1224_v40 = vpop.eup %1223  ;;  %v894_v43 = vsub.f32 %v1428_v35, %v878_v37  ;;  %v851_v46 = vmul.f32 0.6931472, %v1222_v38  ;;  %v823_v48 = vpop.xlane.xlu1 %822 }
 0x505   :  { %v845_v52 = vmul.f32 0.6931472, %v1224_v40  ;;  %1233 = vlog2.f32 %v823_v48  ;;  %v833_v54 = vpop.xlane.xlu0 %832 }
 0x506   :  { %910 = vst [vmem:[%s1627_s7 + $0x10] sm:$0xff] %v894_v43  ;;  %v879_v55 = vadd.f32 %v851_v46, %v1484_v8  ;;  %1235 = vlog2.f32 %v833_v54 }
 0x507   :  { %v1226_v62 = vpop.eup %1225  ;;  %v876_v59 = vadd.f32 %v845_v52, %v1480_v61 }
 0x508   :  { %v1228_v63 = vpop.eup %1227  ;;  %v895_v7 = vsub.f32 %v1434_v3, %v879_v55  ;;  %v847_v12 = vmul.f32 0.6931472, %v1226_v62  ;;  %v835_v35 = vpop.xlane.xlu1 %834 }
 0x509   :  { %v892_v13 = vsub.f32 %v1430_v36, %v876_v59  ;;  %v857_v14 = vmul.f32 0.6931472, %v1228_v63  ;;  %1237 = vlog2.f32 %v835_v35  ;;  %v829_v16 = vpop.xlane.xlu0 %828 }
 0x50a   :  { %911 = vst [vmem:[%s1627_s7 + $0x18] sm:$0xff] %v895_v7  ;;  %v877_v8 = vadd.f32 %v847_v12, %v1488_v11  ;;  %1239 = vlog2.f32 %v829_v16 }
 0x50b   :  { %v1230_v9 = vpop.eup %1229  ;;  %908 = vst [vmem:[%s1627_s7] sm:$0xff] %v892_v13  ;;  %v882_v3 = vadd.f32 %v857_v14, %v1492_v15 }
 0x50c   :  { %v1232_v61 = vpop.eup %1231  ;;  %v893_v36 = vsub.f32 %v1436_v4, %v877_v8  ;;  %v859_v18 = vmul.f32 0.6931472, %v1230_v9  ;;  %v831_v19 = vpop.xlane.xlu1 %830 }
 0x50d   :  { %v898_v21 = vsub.f32 %v1440_v6, %v882_v3  ;;  %v853_v23 = vmul.f32 0.6931472, %v1232_v61  ;;  %1241 = vlog2.f32 %v831_v19  ;;  %v837_v24 = vpop.xlane.xlu0 %836 }
 0x50e   :  { %909 = vst [vmem:[%s1627_s7 + $0x8] sm:$0xff] %v893_v36  ;;  %v883_v11 = vadd.f32 %v859_v18, %v1496_v17  ;;  %1243 = vlog2.f32 %v837_v24 }
 0x50f   :  { %v1234_v25 = vpop.eup %1233  ;;  %914 = vst [vmem:[%s1627_s7 + $0x30] sm:$0xff] %v898_v21  ;;  %v880_v4 = vadd.f32 %v853_v23, %v1500_v20 }
 0x510   :  { %v1236_v15 = vpop.eup %1235  ;;  %v899_v6 = vsub.f32 %v1442_v39, %v883_v11  ;;  %v855_v26 = vmul.f32 0.6931472, %v1234_v25  ;;  %v839_v28 = vpop.xlane.xlu1 %838 }
 0x511   :  { %v896_v29 = vsub.f32 %v1446_v41, %v880_v4  ;;  %v865_v31 = vmul.f32 0.6931472, %v1236_v15  ;;  %1245 = vlog2.f32 %v839_v28  ;;  %v841_v32 = vpop.xlane.xlu0 %840 }
 0x512   :  { %915 = vst [vmem:[%s1627_s7 + $0x38] sm:$0xff] %v899_v6  ;;  %v881_v17 = vadd.f32 %v855_v26, %v1504_v22  ;;  %1247 = vlog2.f32 %v841_v32 }
 0x513   :  { %v1238_v33 = vpop.eup %1237  ;;  %912 = vst [vmem:[%s1627_s7 + $0x20] sm:$0xff] %v896_v29  ;;  %v886_v39 = vadd.f32 %v865_v31, %v1508_v27 }
 0x514   :  { %v1240_v20 = vpop.eup %1239  ;;  %v897_v41 = vsub.f32 %v1448_v42, %v881_v17  ;;  %v867_v34 = vmul.f32 0.6931472, %v1238_v33  ;;  %v843_v1 = vpop.xlane.xlu1 %842 }
 0x515   :  { %v902_v5 = vsub.f32 %v1451_v44, %v886_v39  ;;  %v861_v37 = vmul.f32 0.6931472, %v1240_v20  ;;  %1249 = vlog2.f32 %v843_v1 }
 0x516   :  { %913 = vst [vmem:[%s1627_s7 + $0x28] sm:$0xff] %v897_v41  ;;  %v887_v22 = vadd.f32 %v867_v34, %v1512_v30 }
 0x517   :  { %v1242_v38 = vpop.eup %1241  ;;  %918 = vst [vmem:[%s1627_s7 + $0x50] sm:$0xff] %v902_v5  ;;  %v884_v27 = vadd.f32 %v861_v37, %v1516_v0 }
 0x518   :  { %v1244_v42 = vpop.eup %1243  ;;  %v903_v40 = vsub.f32 %v1454_v47, %v887_v22  ;;  %v863_v43 = vmul.f32 0.6931472, %v1242_v38 }
 0x519   :  { %v900_v44 = vsub.f32 %v1458_v49, %v884_v27  ;;  %v869_v46 = vmul.f32 0.6931472, %v1244_v42 }
 0x51a   :  { %919 = vst [vmem:[%s1627_s7 + $0x58] sm:$0xff] %v903_v40  ;;  %v885_v30 = vadd.f32 %v863_v43, %v1520_v2 }
 0x51b   :  { %v1246_v48 = vpop.eup %1245  ;;  %916 = vst [vmem:[%s1627_s7 + $0x40] sm:$0xff] %v900_v44  ;;  %v888_v0 = vadd.f32 %v869_v46, %v1524_v45 }
 0x51c   :  { %v1248_v52 = vpop.eup %1247  ;;  %v901_v47 = vsub.f32 %v1460_v50, %v885_v30  ;;  %v871_v54 = vmul.f32 0.6931472, %v1246_v48 }
 0x51d   :  { %v904_v49 = vsub.f32 %v1464_v53, %v888_v0  ;;  %v873_v55 = vmul.f32 0.6931472, %v1248_v52 }
 0x51e   :  { %917 = vst [vmem:[%s1627_s7 + $0x48] sm:$0xff] %v901_v47  ;;  %v889_v2 = vadd.f32 %v871_v54, %v1528_v51 }
 0x51f   :  { %v1250_v62 = vpop.eup %1249  ;;  %920 = vst [vmem:[%s1627_s7 + $0x60] sm:$0xff] %v904_v49  ;;  %v890_v45 = vadd.f32 %v873_v55, %v1532_v60 }
 0x520   :  { %v905_v59 = vsub.f32 %v1466_v56, %v889_v2  ;;  %v875_v50 = vmul.f32 0.6931472, %v1250_v62 }
 0x521   :  { %v906_v63 = vsub.f32 %v1469_v57, %v890_v45 }
 0x522   :  { %921 = vst [vmem:[%s1627_s7 + $0x68] sm:$0xff] %v905_v59  ;;  %v891_v53 = vadd.f32 %v875_v50, %v1536_v10 }
 0x523   :  { %922 = vst [vmem:[%s1627_s7 + $0x70] sm:$0xff] %v906_v63 }
 0x524   :  { %v907_v51 = vsub.f32 %v1472_v58, %v891_v53 }
 0x526   :  { %923 = vst [vmem:[%s1627_s7 + $0x78] sm:$0xff] %v907_v51 }

</bundles_post_ra>
